<compile_context>
chip_gen: v7x
topology: tpu7x:2x2x1
jax: 0.10.0
libtpu: 0.0.40
codegen_flags: <defaults>
</compile_context>

<pallas_src>
import jax
import jax.numpy as jnp
from jax.experimental import pallas as pl
from jax.experimental.pallas import tpu as pltpu


# ---------------------------------------------------------------------------
# Host-side parameter packing: four small Linears -> one (H, H) matmul.
# ---------------------------------------------------------------------------
def pack_params(w1, w2, w3, w4, b1, b2, b3, b4):
    w_big = jnp.block([[w1, w3], [w2, w4]])              # (H, H), layout (in, out)
    b_big = jnp.concatenate([b1 + b2, b3 + b4], axis=1)  # (1, H)
    return w_big, b_big


# ---------------------------------------------------------------------------
# Single odefunc evaluation: out = relu((A @ x) @ W_big + b_big)
# Row-tiled over the nodes so it scales to large N and pipelines A's DMA.
# ---------------------------------------------------------------------------
def _odefunc_kernel(a_ref, x_ref, w_ref, b_ref, o_ref):
    # One fused graph-propagation matmul for both halves of x.
    g = jnp.dot(a_ref[...], x_ref[...], preferred_element_type=jnp.float32)
    # All four Linears as a single matmul against the packed weight.
    out = jnp.dot(g.astype(w_ref.dtype), w_ref[...],
                  preferred_element_type=jnp.float32) + b_ref[...]
    o_ref[...] = jnp.maximum(out, 0.0).astype(o_ref.dtype)


def _choose_row_tile(n_rows, itemsize, a_tile_budget=8 * 1024 * 1024):
    """Rows per grid step: large tiles amortize per-step overhead, but the
    double-buffered (TM, N) tile of A must stay well inside scoped VMEM
    (re-derived per call so it also fits v7x's smaller 64 MiB VMEM)."""
    if n_rows <= 8:
        return n_rows
    tm = a_tile_budget // (2 * n_rows * itemsize)
    tm = int(max(8, min(tm, 1024, n_rows)))
    return (tm // 8) * 8


def odefunc_forward(A, x, w_big, b_big, *, compute_dtype=None, tm=None):
    """One evaluation of f(x) = relu((A @ x) @ W_big + b_big)."""
    N, H = x.shape
    if compute_dtype is not None:           # e.g. bf16 MXU inputs on v6e/v7x
        A = A.astype(compute_dtype)
        x = x.astype(compute_dtype)
        w_big = w_big.astype(compute_dtype)
    b_big = b_big.astype(jnp.float32)

    itemsize = jnp.dtype(A.dtype).itemsize
    if tm is None:
        tm = _choose_row_tile(N, itemsize)
    grid = (pl.cdiv(N, tm),)

    # Only raise the scoped-VMEM limit when the tiles actually need it
    # (keep headroom below v7x's 64 MiB physical VMEM).
    est = 2 * (tm * N + N * H + H * H) * itemsize + 2 * (tm * H + H) * 4
    vmem_limit = min(est + (4 << 20), 48 * 1024 * 1024) if est > (12 << 20) else None

    return pl.pallas_call(
        _odefunc_kernel,
        out_shape=jax.ShapeDtypeStruct((N, H), jnp.float32),
        grid=grid,
        in_specs=[
            pl.BlockSpec((tm, N), lambda i: (i, 0)),   # A: row tile, pipelined
            pl.BlockSpec((N, H), lambda i: (0, 0)),    # x: resident
            pl.BlockSpec((H, H), lambda i: (0, 0)),    # W_big: resident
            pl.BlockSpec((1, H), lambda i: (0, 0)),    # b_big: resident
        ],
        out_specs=pl.BlockSpec((tm, H), lambda i: (i, 0)),
        compiler_params=pltpu.CompilerParams(
            dimension_semantics=("parallel",),          # row tiles are independent
            vmem_limit_bytes=vmem_limit,
        ),
    )(A, x, w_big, b_big)


# ---------------------------------------------------------------------------
# Full ODEBlock forward: fixed-step RK4 over vt inside one pallas_call.
# A, W_big, b_big are loaded once and stay VMEM-resident for every step.
# TODO(synk): this step-resident kernel assumes the full (N, N) A fits in
# VMEM; for very large graphs use odefunc_forward per solver step instead.
# ---------------------------------------------------------------------------
def _rk4_kernel(vt_ref, a_ref, x0_ref, w_ref, b_ref, traj_ref, state_ref):
    s = pl.program_id(0)

    def f(x):
        g = jnp.dot(a_ref[...], x, preferred_element_type=jnp.float32)
        out = jnp.dot(g, w_ref[...], preferred_element_type=jnp.float32) + b_ref[...]
        return jnp.maximum(out, 0.0)

    @pl.when(s == 0)
    def _():
        state_ref[...] = x0_ref[...].astype(jnp.float32)

    @pl.when(s > 0)
    def _():
        dt = vt_ref[s] - vt_ref[s - 1]
        x = state_ref[...]
        k1 = f(x)
        k2 = f(x + 0.5 * dt * k1)
        k3 = f(x + 0.5 * dt * k2)
        k4 = f(x + dt * k3)
        state_ref[...] = x + (dt / 6.0) * (k1 + 2.0 * k2 + 2.0 * k3 + k4)

    traj_ref[0] = state_ref[...].astype(traj_ref.dtype)


def odeblock_forward(vt, A, x0, w_big, b_big, *, terminal=False):
    T = vt.shape[0]
    N, H = x0.shape
    vt = vt.astype(jnp.float32)
    A = A.astype(jnp.float32)
    x0 = x0.astype(jnp.float32)
    w_big = w_big.astype(jnp.float32)
    b_big = b_big.astype(jnp.float32)

    traj = pl.pallas_call(
        _rk4_kernel,
        out_shape=jax.ShapeDtypeStruct((T, N, H), jnp.float32),
        grid_spec=pltpu.PrefetchScalarGridSpec(
            num_scalar_prefetch=1,                         # vt -> SMEM scalars
            grid=(T,),
            in_specs=[
                pl.BlockSpec((N, N), lambda s, _vt: (0, 0)),  # A: loaded once
                pl.BlockSpec((N, H), lambda s, _vt: (0, 0)),  # x0
                pl.BlockSpec((H, H), lambda s, _vt: (0, 0)),  # W_big: loaded once
                pl.BlockSpec((1, H), lambda s, _vt: (0, 0)),  # b_big: loaded once
            ],
            out_specs=pl.BlockSpec((1, N, H), lambda s, _vt: (s, 0, 0)),
            scratch_shapes=[pltpu.VMEM((N, H), jnp.float32)],  # ODE state
        ),
        compiler_params=pltpu.CompilerParams(
            dimension_semantics=("arbitrary",),            # steps are sequential
        ),
    )(vt, A, x0, w_big, b_big)
    return traj[-1] if terminal else traj


# ---------------------------------------------------------------------------
# Pure-JAX references (use the original, unpacked parameterization).
# ---------------------------------------------------------------------------
def reference_odefunc(A, x, w1, w2, w3, w4, b1, b2, b3, b4):
    H = x.shape[1]
    h = H // 2
    g1 = A @ x[:, :h]
    g2 = A @ x[:, h:]
    o1 = g1 @ w1 + b1 + g2 @ w2 + b2
    o2 = g1 @ w3 + b3 + g2 @ w4 + b4
    return jnp.maximum(jnp.concatenate([o1, o2], axis=1), 0.0)


def reference_odeblock(vt, A, x0, w1, w2, w3, w4, b1, b2, b3, b4):
    f = lambda x: reference_odefunc(A, x, w1, w2, w3, w4, b1, b2, b3, b4)
    xs = [x0]
    x = x0
    for s in range(1, vt.shape[0]):
        dt = vt[s] - vt[s - 1]
        k1 = f(x)
        k2 = f(x + 0.5 * dt * k1)
        k3 = f(x + 0.5 * dt * k2)
        k4 = f(x + dt * k3)
        x = x + (dt / 6.0) * (k1 + 2.0 * k2 + 2.0 * k3 + k4)
        xs.append(x)
    return jnp.stack(xs, axis=0)


if __name__ == "__main__":
    N_NODES = 16
    HIDDEN = 32
    T_STEPS = 5
    h = HIDDEN // 2

    key = jax.random.PRNGKey(0)
    ks = jax.random.split(key, 10)

    x = jax.random.normal(ks[0], (N_NODES, HIDDEN), dtype=jnp.float32)
    A = jax.random.normal(ks[1], (N_NODES, N_NODES), dtype=jnp.float32) / N_NODES
    vt = jnp.linspace(0.0, 1.0, T_STEPS, dtype=jnp.float32)

    bound = 1.0 / (h ** 0.5)
    w1 = jax.random.uniform(ks[2], (h, h), jnp.float32, -bound, bound)
    w2 = jax.random.uniform(ks[3], (h, h), jnp.float32, -bound, bound)
    w3 = jax.random.uniform(ks[4], (h, h), jnp.float32, -bound, bound)
    w4 = jax.random.uniform(ks[5], (h, h), jnp.float32, -bound, bound)
    b1 = jax.random.uniform(ks[6], (1, h), jnp.float32, -bound, bound)
    b2 = jax.random.uniform(ks[7], (1, h), jnp.float32, -bound, bound)
    b3 = jax.random.uniform(ks[8], (1, h), jnp.float32, -bound, bound)
    b4 = jax.random.uniform(ks[9], (1, h), jnp.float32, -bound, bound)

    w_big, b_big = pack_params(w1, w2, w3, w4, b1, b2, b3, b4)

    # 1) Single odefunc evaluation (packed weights, row-tiled), f32.
    out = jax.block_until_ready(odefunc_forward(A, x, w_big, b_big))
    ref = reference_odefunc(A, x, w1, w2, w3, w4, b1, b2, b3, b4)
    assert out.shape == (N_NODES, HIDDEN)
    assert jnp.allclose(out, ref, atol=1e-4, rtol=1e-4)

    # 2) Same kernel with bf16 MXU inputs (f32 accumulation) — looser tol.
    out_bf16 = jax.block_until_ready(
        odefunc_forward(A, x, w_big, b_big, compute_dtype=jnp.bfloat16))
    assert jnp.allclose(out_bf16, ref, atol=5e-2, rtol=5e-2)

    # 3) Full ODEBlock forward: fixed-step RK4 over vt, weights VMEM-resident.
    traj = jax.block_until_ready(odeblock_forward(vt, A, x, w_big, b_big))
    traj_ref = reference_odeblock(vt, A, x, w1, w2, w3, w4, b1, b2, b3, b4)
    assert traj.shape == (T_STEPS, N_NODES, HIDDEN)
    assert jnp.allclose(traj, traj_ref, atol=1e-4, rtol=1e-4)

    print("KERNEL_OK")
</pallas_src>

<mosaic_0001>
module attributes {stable_mosaic.version = 11 : i64} {
  func.func @_odefunc_kernel(%arg0: i32, %arg1: memref<16x16xf32, #tpu.memory_space<vmem>>, %arg2: memref<16x32xf32, #tpu.memory_space<vmem>>, %arg3: memref<32x32xf32, #tpu.memory_space<vmem>>, %arg4: memref<1x32xf32, #tpu.memory_space<vmem>>, %arg5: memref<16x32xf32, #tpu.memory_space<vmem>>) attributes {dimension_semantics = [#tpu.dimension_semantics<parallel>], iteration_bounds = array<i64: 1>, scalar_prefetch = 0 : i64, scratch_operands = 0 : i64, tpu.core_type = #tpu.core_type<tc>, window_params = [{transform_indices = @transform_0, window_bounds = array<i64: 16, 16>}, {pipeline_mode = #tpu.pipeline_mode<synchronous>, transform_indices = @transform_1, window_bounds = array<i64: 16, 32>}, {pipeline_mode = #tpu.pipeline_mode<synchronous>, transform_indices = @transform_2, window_bounds = array<i64: 32, 32>}, {pipeline_mode = #tpu.pipeline_mode<synchronous>, transform_indices = @transform_3, window_bounds = array<i64: 1, 32>}, {transform_indices = @transform_4, window_bounds = array<i64: 16, 32>}]} {
    %c0 = arith.constant 0 : index
    %c0_0 = arith.constant 0 : index
    %0 = vector.load %arg1[%c0, %c0_0] : memref<16x16xf32, #tpu.memory_space<vmem>>, vector<16x16xf32>
    %c0_1 = arith.constant 0 : index
    %c0_2 = arith.constant 0 : index
    %1 = vector.load %arg2[%c0_1, %c0_2] : memref<16x32xf32, #tpu.memory_space<vmem>>, vector<16x32xf32>
    %cst = arith.constant dense<0.000000e+00> : vector<16x32xf32>
    %2 = tpu.matmul %0, %1, %cst {dimension_numbers = #tpu.dot_dimension_numbers<[1], [0], [0], [1], [0, 0, 1, 1], [], []>} : vector<16x16xf32>, vector<16x32xf32>, vector<16x32xf32> -> vector<16x32xf32>
    %c0_3 = arith.constant 0 : index
    %c0_4 = arith.constant 0 : index
    %3 = vector.load %arg3[%c0_3, %c0_4] : memref<32x32xf32, #tpu.memory_space<vmem>>, vector<32x32xf32>
    %cst_5 = arith.constant dense<0.000000e+00> : vector<16x32xf32>
    %4 = tpu.matmul %2, %3, %cst_5 {dimension_numbers = #tpu.dot_dimension_numbers<[1], [0], [0], [1], [0, 0, 1, 1], [], []>} : vector<16x32xf32>, vector<32x32xf32>, vector<16x32xf32> -> vector<16x32xf32>
    %c0_6 = arith.constant 0 : index
    %c0_7 = arith.constant 0 : index
    %5 = vector.load %arg4[%c0_6, %c0_7] : memref<1x32xf32, #tpu.memory_space<vmem>>, vector<1x32xf32>
    %6 = vector.broadcast %5 : vector<1x32xf32> to vector<16x32xf32>
    %7 = arith.addf %4, %6 : vector<16x32xf32>
    %cst_8 = arith.constant 0.000000e+00 : f32
    %8 = vector.broadcast %cst_8 : f32 to vector<16x32xf32>
    %9 = arith.maximumf %7, %8 : vector<16x32xf32>
    %c0_9 = arith.constant 0 : index
    %c0_10 = arith.constant 0 : index
    %10 = vector.load %arg5[%c0_9, %c0_10] : memref<16x32xf32, #tpu.memory_space<vmem>>, vector<16x32xf32>
    tpu.vector_store %arg5[%c0_9, %c0_10], %9 {strides = array<i32>} : memref<16x32xf32, #tpu.memory_space<vmem>>, vector<16x32xf32>,
    return
  }
  func.func @transform_0(%arg0: i32) -> (i32, i32) {
    %c0_i32 = arith.constant 0 : i32
    %c0_i32_0 = arith.constant 0 : i32
    return %arg0, %c0_i32 : i32, i32
  }
  func.func @transform_1(%arg0: i32) -> (i32, i32) {
    %c0_i32 = arith.constant 0 : i32
    %c0_i32_0 = arith.constant 0 : i32
    %c0_i32_1 = arith.constant 0 : i32
    return %c0_i32, %c0_i32_0 : i32, i32
  }
  func.func @transform_2(%arg0: i32) -> (i32, i32) {
    %c0_i32 = arith.constant 0 : i32
    %c0_i32_0 = arith.constant 0 : i32
    %c0_i32_1 = arith.constant 0 : i32
    return %c0_i32, %c0_i32_0 : i32, i32
  }
  func.func @transform_3(%arg0: i32) -> (i32, i32) {
    %c0_i32 = arith.constant 0 : i32
    %c0_i32_0 = arith.constant 0 : i32
    %c0_i32_1 = arith.constant 0 : i32
    return %c0_i32, %c0_i32_0 : i32, i32
  }
  func.func @transform_4(%arg0: i32) -> (i32, i32) {
    %c0_i32 = arith.constant 0 : i32
    %c0_i32_0 = arith.constant 0 : i32
    return %arg0, %c0_i32 : i32, i32
  }
}

</mosaic_0001>

<bundles_post_ra>
// kernel: tpu_custom_call.1
= control target key start
LH: loop header
LB: loop body
LE: loop exit
PB: predicated region body
PF: predicated region fallthrough
CT: control target
= control target key end

     0   :  { %9 = vsyncpa [#allocation3], 0  ;;  %s512_s0 = inlined_call_operand.hbm [shape: f32[16,16], index: 0, kind: input, shape index: {}]   ;;  %s513_s1 = inlined_call_operand.hbm [shape: f32[16,32], index: 1, kind: input, shape index: {}]   ;;  %s514_s2 = inlined_call_operand.hbm [shape: f32[32,32], index: 2, kind: input, shape index: {}]   ;;  %s515_s3 = inlined_call_operand.vmem [shape: f32[1,32], index: 3, kind: input, shape index: {}]   ;;  %s516_s4 = inlined_call_operand.hbm [shape: f32[16,32], index: 4, kind: output, shape index: {}]  }
   0x1   :  { %10 = vsyncpa [#allocation6], 0 }
   0x2   :  { %11 = vsyncpa [#allocation4], 0  ;;  %s405_s15 = smov [#allocation5]   ;;  %s406_s17 = smov [#allocation2]  }
   0x3   :  { %s29_s16 = sshll.u32 %s405_s15, 4  ;;  %s17_s18 = sshll.u32 %s406_s17, 4  ;;  %s30_s16 = int_to_ptr.vmem [resolvable:$true] %s29_s16  ;;  %s436_s18 = int_to_ptr.vmem [resolvable:$true] %s17_s18 }
   0x4   :  { %s311_s21 = scalar_lea.hbm %s513_s1, 256 }
   0x5   :  { %p312_p0 = scmp.ne.s32.totalorder %s513_s1, %s311_s21  ;;  %p315_p1 = scmp.lt.u32.totalorder %s311_s21, %s513_s1 }
   0x7   :  { %p317_p2 = pnand %p315_p1, %p312_p0 }
   0x9   :  { %320 = shalt.err (!%p317_p2)
}
   0xa   :  { %s321_s26 = scalar_lea.vmem %s30_s16, 256  ;;  %p326_p4 = scmp.lt.s32.totalorder %s30_s16, %s30_s16 }
   0xb   :  { %p322_p3 = scmp.ne.s32.totalorder %s30_s16, %s321_s26  ;;  %p327_p5 = scmp.lt.s32.totalorder %s321_s26, %s321_s26 }
   0xd   :  { %p328_p6 = por %p327_p5, %p326_p4 }
   0xf   :  { %p329_p7 = pnand %p328_p6, %p322_p3 }
  0x11   :  { %332 = shalt.err (!%p329_p7)
}
  0x12   :  { %s407_s27 = smov 128   ;;  %s408_s28 = smov 8  }
  0x13   :  { %35 = dma.hbm_to_vmem [thread:$0]  %s513_s1, 256, %s30_s16, [#allocation6], %s407_s27, %s407_s27, %s408_s28  }
  0x14   :  { %s333_s7 = scalar_lea.hbm %s512_s0, 256 }
  0x15   :  { %p334_p8 = scmp.ne.s32.totalorder %s512_s0, %s333_s7  ;;  %p337_p9 = scmp.lt.u32.totalorder %s333_s7, %s512_s0 }
  0x17   :  { %p339_p10 = pnand %p337_p9, %p334_p8 }
  0x19   :  { %342 = shalt.err (!%p339_p10)
}
  0x1a   :  { %s343_s12 = scalar_lea.vmem %s436_s18, 256  ;;  %p348_p12 = scmp.lt.s32.totalorder %s436_s18, %s436_s18 }
  0x1b   :  { %p344_p11 = scmp.ne.s32.totalorder %s436_s18, %s343_s12  ;;  %p349_p13 = scmp.lt.s32.totalorder %s343_s12, %s343_s12 }
  0x1d   :  { %p350_p0 = por %p349_p13, %p348_p12 }
  0x1f   :  { %p351_p1 = pnand %p350_p0, %p344_p11 }
  0x21   :  { %354 = shalt.err (!%p351_p1)
}
  0x22   :  { %23 = dma.hbm_to_vmem [thread:$0]  %s512_s0, 256, %s436_s18, [#allocation3], %s407_s27, %s407_s27, %s408_s28  }
  0x23   :  { %s409_s14 = smov [#allocation7]   ;;  %s355_s19 = scalar_lea.hbm %s514_s2, 512 }
  0x24   :  { %s41_s15 = sshll.u32 %s409_s14, 4  ;;  %p356_p2 = scmp.ne.s32.totalorder %s514_s2, %s355_s19  ;;  %s42_s15 = int_to_ptr.vmem [resolvable:$true] %s41_s15 }
  0x25   :  { %p359_p3 = scmp.lt.u32.totalorder %s355_s19, %s514_s2 }
  0x27   :  { %p361_p4 = pnand %p359_p3, %p356_p2 }
  0x29   :  { %364 = shalt.err (!%p361_p4)
}
  0x2a   :  { %s365_s24 = scalar_lea.vmem %s42_s15, 512  ;;  %p370_p6 = scmp.lt.s32.totalorder %s42_s15, %s42_s15 }
  0x2b   :  { %p366_p5 = scmp.ne.s32.totalorder %s42_s15, %s365_s24  ;;  %p371_p7 = scmp.lt.s32.totalorder %s365_s24, %s365_s24 }
  0x2d   :  { %p372_p8 = por %p371_p7, %p370_p6 }
  0x2f   :  { %p373_p9 = pnand %p372_p8, %p366_p5 }
  0x31   :  { %376 = shalt.err (!%p373_p9)
}
  0x32   :  { %47 = dma.hbm_to_vmem [thread:$0]  %s514_s2, 512, %s42_s15, [#allocation6], %s407_s27, %s407_s27, %s408_s28  }
  0x33   :  { %399 = dma.done.wait [#allocation3], 256  }
  0x34   :  { %400 = vsyncadd [#allocation3], 4294967040 }
  0x35   :  { %401 = dma.done.wait [#allocation6], 768  }
  0x36   :  { %402 = vsyncadd [#allocation6], 4294966528  ;;  %vm63_vm0 = vcmask 130048   ;;  %v61_v0 = vld [vmem:[#allocation5] sm:$0xff]  ;;  %v62_v1 = vld [vmem:[#allocation5 + $0x8] sm:$0xff]  ;;  %vm156_vm1 = vcmask 261120  }
  0x37   :  { %v59_v2 = vld [vmem:[#allocation2] sm:$0xff]  ;;  %v293_v3 = vpack.c.bf16 %v62_v1, %v61_v0  ;;  %v146_v5 = vld [vmem:[#allocation7 + $0x8] sm:$0xff]  ;;  %v147_v7 = vld [vmem:[#allocation7 + $0x10] sm:$0xff]  ;;  %s410_s26 = smov [#allocation8]  }
  0x38   :  { %279 = vmatprep.mubr.msk.f32.mxu0 %vm63_vm0, %v59_v2  ;;  %v145_v4 = vld [vmem:[#allocation7] sm:$0xff]  ;;  %v148_v8 = vld [vmem:[#allocation7 + $0x18] sm:$0xff]  ;;  %v60_v10 = vld [vmem:[#allocation2 + $0x8] sm:$0xff]  ;;  %s247_s29 = sshll.u32 %s410_s26, 4  ;;  %s248_s29 = int_to_ptr.vmem [resolvable:$true] %s247_s29 }
  0x39   :  { %v297_v6 = vpack.c.bf16 %v146_v5, %v145_v4  ;;  %294 = vmatprep.subr.bf16.mxu0 %v293_v3  ;;  %v301_v9 = vpack.c.bf16 %v148_v8, %v147_v7  ;;  %v262_v13 = vld [vmem:[%s515_s3] ss:$0 sm:$0xff]  ;;  %s377_s30 = scalar_lea.vmem %s248_s29, 256  ;;  %p382_p11 = scmp.lt.s32.totalorder %s248_s29, %s248_s29 }
  0x3a   :  { %296 = vmatpush3.bf16.msra.mxu0 %v293_v3  ;;  %p378_p10 = scmp.ne.s32.totalorder %s248_s29, %s377_s30  ;;  %p383_p12 = scmp.lt.s32.totalorder %s377_s30, %s377_s30 }
  0x3b   :  { %298 = vmatprep.subr.bf16.mxu1 %v297_v6 }
  0x3c   :  { %300 = vmatpush3.bf16.msra.mxu1 %v297_v6  ;;  %p384_p13 = por %p383_p12, %p382_p11 }
  0x3d   :  { %302 = vmatprep.subr.bf16.mxu1 %v301_v9  ;;  %280 = vmatmul.mubr.msk.f32.vlgmr.msra.gmra.mrb[0].mxu0 %vm63_vm0, %v60_v10 }
  0x3e   :  { %p385_p0 = pnand %p384_p13, %p378_p10 }
  0x40   :  { %304 = vmatpush3.bf16.msra.mxu1 %v301_v9 }
 0x110   :  { %v281_v11 = vpop.f32.mrb[0].mxu0 }
 0x111   :  { %v136_v12 = vpop.f32.mrb[1].mxu0 }
 0x112   :  { %290 = vmatprep.mubr.msk.f32.mxu1 %vm156_vm1, %v136_v12 }
 0x113   :  { %291 = vmatmul.mubr.msk.f32.vlgmr.msra.gmra.mrb[0].mxu1 %vm156_vm1, %v281_v11 }
 0x1e6   :  { %v292_v14 = vpop.f32.mrb[0].mxu1 }
 0x1e7   :  { %v235_v15 = vadd.f32 %v292_v14, %v262_v13  ;;  %v229_v16 = vpop.f32.mrb[1].mxu1 }
 0x1e8   :  { %v230_v17 = vadd.f32 %v262_v13, %v229_v16 }
 0x1e9   :  { %v239_v18 = vmax.f32 %v235_v15, 0.0 }
 0x1ea   :  { %v238_v19 = vmax.f32 %v230_v17, 0.0 }
 0x1eb   :  { %241 = vst.msk [vmem:[#allocation8 + $0x8] sm:$0xff] %vm156_vm1, %v239_v18 }
 0x1ec   :  { %240 = vst.msk [vmem:[#allocation8] sm:$0xff] %vm156_vm1, %v238_v19 }
 0x1ed   :  { %388 = shalt.err (!%p385_p0)
}
 0x1ee   :  { %s389_s6 = scalar_lea.hbm %s516_s4, 256 }
 0x1ef   :  { %p390_p1 = scmp.ne.s32.totalorder %s516_s4, %s389_s6  ;;  %p393_p2 = scmp.lt.u32.totalorder %s389_s6, %s516_s4 }
 0x1f1   :  { %p395_p3 = pnand %p393_p2, %p390_p1 }
 0x1f3   :  { %398 = shalt.err (!%p395_p3)
}
 0x1f4   :  { %253 = dma.vmem_to_hbm [thread:$0]  %s248_s29, 256, %s516_s4, [#allocation4], %s407_s27, %s407_s27, %s408_s28  }
 0x1f5   :  { %403 = dma.done.wait [#allocation4], 256  }
 0x1f6   :  { %404 = vsyncadd [#allocation4], 4294967040 }
 0x1f7   :  { %257 = vsyncpa [#allocation3], 1 }
 0x1f8   :  { %258 = vsyncpa [#allocation6], 1 }
 0x1f9   :  { %259 = vsyncpa [#allocation4], 1 }

</bundles_post_ra>
